<compile_context>
chip_gen: v5e
topology: v5e:2x2
jax: 0.10.0
libtpu: 0.0.40
codegen_flags: <defaults>
</compile_context>

<pallas_src>
import jax
import jax.numpy as jnp
from jax.experimental import pallas as pl
from jax.experimental.pallas import tpu as pltpu


def _round_up(x, m):
    return ((x + m - 1) // m) * m


# ---------------------------------------------------------------------------
# Kernel 1: XW_scaled = D_src^{-1/2} * (X @ W)   (computed once, row-tiled)
# ---------------------------------------------------------------------------
def xw_scale_kernel(d_ref, x_ref, w_ref, o_ref):
    xw = jnp.dot(x_ref[...], w_ref[...], preferred_element_type=jnp.float32)
    o_ref[...] = (d_ref[...] * xw).astype(o_ref.dtype)


# ---------------------------------------------------------------------------
# Kernel 2: tiled aggregation
#   out = PReLU( D_dst^{-1/2} * ((A + I) @ XW_scaled) + b )
# grid = (dst-row blocks [parallel], src blocks [arbitrary / reduction last])
# ---------------------------------------------------------------------------
def gcn_agg_kernel(a_ref, xw_ref, d_ref, b_ref, alpha_ref, o_ref, acc_ref):
    k = pl.program_id(1)

    @pl.when(k == 0)
    def _():
        acc_ref[...] = jnp.zeros_like(acc_ref)

    acc_ref[...] += jnp.dot(a_ref[...], xw_ref[...],
                            preferred_element_type=jnp.float32)

    @pl.when(k == pl.num_programs(1) - 1)
    def _():
        h = d_ref[...] * acc_ref[...] + b_ref[...]
        o_ref[...] = jnp.where(h > 0.0, h, alpha_ref[...] * h).astype(o_ref.dtype)


# ---------------------------------------------------------------------------
# Encoder forward (GCNConv + PReLU) via the two kernels above.
# ---------------------------------------------------------------------------
def encoder_forward(x, edge_index, weight, bias, prelu_alpha, *, tm=256, tk=512):
    n, c_in = x.shape
    h = weight.shape[1]

    # --- glue: dense A+I and D^{-1/2} (data-dependent scatter; plain JAX) ---
    src, dst = edge_index[0], edge_index[1]
    a = jnp.zeros((n, n), dtype=jnp.float32).at[dst, src].add(1.0)
    a = a + jnp.eye(n, dtype=jnp.float32)
    deg = a.sum(axis=1)
    d_inv_sqrt = jnp.where(deg > 0, jax.lax.rsqrt(deg), 0.0)

    # --- tile-aligned padded shapes (v7x-safe tile sizes by default) ---
    tm = min(tm, _round_up(n, 8))       # dst-row tile (sublane axis)
    tk = min(tk, _round_up(n, 128))     # src tile (lane axis of A)
    n_dst = _round_up(n, tm)
    n_src = _round_up(n, tk)
    h_pad = _round_up(h, 128)           # lane-dense output width

    a_p = jnp.pad(a, ((0, n_dst - n), (0, n_src - n))).astype(jnp.bfloat16)
    x_p = jnp.pad(x.astype(jnp.float32), ((0, n_src - n), (0, 0)))
    w_p = jnp.pad(weight.astype(jnp.float32), ((0, 0), (0, h_pad - h)))
    b_p = jnp.pad(bias.astype(jnp.float32), (0, h_pad - h)).reshape(1, h_pad)
    alpha_p = jnp.pad(prelu_alpha.astype(jnp.float32),
                      (0, h_pad - h)).reshape(1, h_pad)
    d_src = jnp.pad(d_inv_sqrt, (0, n_src - n)).reshape(n_src, 1)
    d_dst = jnp.pad(d_inv_sqrt, (0, n_dst - n)).reshape(n_dst, 1)

    # --- kernel 1: XW (scaled by source-side D^{-1/2}), stored bf16 ---
    xw = pl.pallas_call(
        xw_scale_kernel,
        out_shape=jax.ShapeDtypeStruct((n_src, h_pad), jnp.bfloat16),
        grid=(n_src // tk,),
        in_specs=[
            pl.BlockSpec((tk, 1), lambda r: (r, 0)),
            pl.BlockSpec((tk, c_in), lambda r: (r, 0)),
            pl.BlockSpec((c_in, h_pad), lambda r: (0, 0)),
        ],
        out_specs=pl.BlockSpec((tk, h_pad), lambda r: (r, 0)),
        compiler_params=pltpu.CompilerParams(
            dimension_semantics=("parallel",)),
    )(d_src, x_p, w_p)

    # --- kernel 2: tiled (A+I) @ XW with f32 accumulator + bias + PReLU ---
    cost = pl.CostEstimate(
        flops=2 * n_dst * n_src * h_pad + 2 * n_src * c_in * h_pad,
        transcendentals=0,
        bytes_accessed=a_p.size * 2 + xw.size * 2 + n_dst * h_pad * 4,
    )
    out = pl.pallas_call(
        gcn_agg_kernel,
        out_shape=jax.ShapeDtypeStruct((n_dst, h_pad), jnp.float32),
        grid_spec=pltpu.PrefetchScalarGridSpec(
            num_scalar_prefetch=0,
            grid=(n_dst // tm, n_src // tk),
            in_specs=[
                pl.BlockSpec((tm, tk), lambda i, k: (i, k)),       # A+I tile
                pl.BlockSpec((tk, h_pad), lambda i, k: (k, 0)),    # XW tile
                pl.BlockSpec((tm, 1), lambda i, k: (i, 0)),        # d_dst rows
                pl.BlockSpec((1, h_pad), lambda i, k: (0, 0)),     # bias
                pl.BlockSpec((1, h_pad), lambda i, k: (0, 0)),     # alpha
            ],
            out_specs=pl.BlockSpec((tm, h_pad), lambda i, k: (i, 0)),
            scratch_shapes=[pltpu.VMEM((tm, h_pad), jnp.float32)],
        ),
        compiler_params=pltpu.CompilerParams(
            dimension_semantics=("parallel", "arbitrary"),
            vmem_limit_bytes=32 * 1024 * 1024,
        ),
        cost_estimate=cost,
    )(a_p, xw, d_dst, b_p, alpha_p)

    return out[:n, :h]


# ---------------------------------------------------------------------------
# GraphLocalInfomax.forward: pos_z, neg_z (corrupted), summary.
# ---------------------------------------------------------------------------
def graph_local_infomax_forward(x, edge_index, weight, bias, prelu_alpha, perm_key):
    pos_z = encoder_forward(x, edge_index, weight, bias, prelu_alpha)
    perm = jax.random.permutation(perm_key, x.shape[0])       # corruption()
    neg_z = encoder_forward(x[perm], edge_index, weight, bias, prelu_alpha)
    # TODO(synk): `summary` is a user-injected module in GraphLocalInfomax; a
    # DGI-style sigmoid(mean) readout is used here as a stand-in.
    summary = jax.nn.sigmoid(jnp.mean(pos_z, axis=0))
    return pos_z, neg_z, summary


# ---------------------------------------------------------------------------
# f32 reference (no Pallas, no bf16) for numerical check.
# ---------------------------------------------------------------------------
def reference_encoder(x, edge_index, weight, bias, prelu_alpha):
    n = x.shape[0]
    src, dst = edge_index[0], edge_index[1]
    a = jnp.zeros((n, n), dtype=jnp.float32).at[dst, src].add(1.0)
    a = a + jnp.eye(n, dtype=jnp.float32)
    deg = a.sum(axis=1)
    d = jnp.where(deg > 0, 1.0 / jnp.sqrt(deg), 0.0)
    a_norm = d[:, None] * a * d[None, :]
    out = a_norm @ (x @ weight) + bias[None, :]
    return jnp.where(out > 0, out, prelu_alpha[None, :] * out)


if __name__ == "__main__":
    key = jax.random.PRNGKey(0)
    N, C_IN, HID, E = 16, 8, 32, 40

    k_x, k_e, k_w, k_p = jax.random.split(key, 4)
    x = jax.random.normal(k_x, (N, C_IN), dtype=jnp.float32)
    edge_index = jax.random.randint(k_e, (2, E), 0, N, dtype=jnp.int32)

    weight = jax.random.normal(k_w, (C_IN, HID), dtype=jnp.float32) * (1.0 / jnp.sqrt(C_IN))
    bias = jnp.zeros((HID,), dtype=jnp.float32)
    prelu_alpha = jnp.full((HID,), 0.25, dtype=jnp.float32)

    pos_z, neg_z, summary = graph_local_infomax_forward(
        x, edge_index, weight, bias, prelu_alpha, k_p)
    jax.block_until_ready((pos_z, neg_z, summary))

    # Check the Pallas encoder against the f32 reference (bf16 MXU inputs ->
    # loosened tolerance).
    ref_pos = reference_encoder(x, edge_index, weight, bias, prelu_alpha)
    perm = jax.random.permutation(k_p, N)
    ref_neg = reference_encoder(x[perm], edge_index, weight, bias, prelu_alpha)

    assert pos_z.shape == (N, HID) and neg_z.shape == (N, HID)
    assert summary.shape == (HID,)
    assert jnp.allclose(pos_z, ref_pos, atol=3e-2, rtol=3e-2)
    assert jnp.allclose(neg_z, ref_neg, atol=3e-2, rtol=3e-2)

    print("KERNEL_OK")
</pallas_src>

<mosaic_0001>
module attributes {stable_mosaic.version = 11 : i64} {
  func.func @xw_scale_kernel(%arg0: i32, %arg1: memref<128x1xf32, #tpu.memory_space<vmem>>, %arg2: memref<128x8xf32, #tpu.memory_space<vmem>>, %arg3: memref<8x128xf32, #tpu.memory_space<vmem>>, %arg4: memref<128x128xbf16, #tpu.memory_space<vmem>>) attributes {dimension_semantics = [#tpu.dimension_semantics<parallel>], iteration_bounds = array<i64: 1>, scalar_prefetch = 0 : i64, scratch_operands = 0 : i64, tpu.core_type = #tpu.core_type<tc>, window_params = [{transform_indices = @transform_0, window_bounds = array<i64: 128, 1>}, {transform_indices = @transform_1, window_bounds = array<i64: 128, 8>}, {pipeline_mode = #tpu.pipeline_mode<synchronous>, transform_indices = @transform_2, window_bounds = array<i64: 8, 128>}, {transform_indices = @transform_3, window_bounds = array<i64: 128, 128>}]} {
    %c0 = arith.constant 0 : index
    %c0_0 = arith.constant 0 : index
    %0 = vector.load %arg2[%c0, %c0_0] : memref<128x8xf32, #tpu.memory_space<vmem>>, vector<128x8xf32>
    %c0_1 = arith.constant 0 : index
    %c0_2 = arith.constant 0 : index
    %1 = vector.load %arg3[%c0_1, %c0_2] : memref<8x128xf32, #tpu.memory_space<vmem>>, vector<8x128xf32>
    %cst = arith.constant dense<0.000000e+00> : vector<128x128xf32>
    %2 = tpu.matmul %0, %1, %cst {dimension_numbers = #tpu.dot_dimension_numbers<[1], [0], [0], [1], [0, 0, 1, 1], [], []>} : vector<128x8xf32>, vector<8x128xf32>, vector<128x128xf32> -> vector<128x128xf32>
    %c0_3 = arith.constant 0 : index
    %c0_4 = arith.constant 0 : index
    %3 = vector.load %arg1[%c0_3, %c0_4] : memref<128x1xf32, #tpu.memory_space<vmem>>, vector<128x1xf32>
    %4 = vector.broadcast %3 : vector<128x1xf32> to vector<128x128xf32>
    %5 = arith.mulf %4, %2 : vector<128x128xf32>
    %6 = arith.truncf %5 : vector<128x128xf32> to vector<128x128xbf16>
    %c0_5 = arith.constant 0 : index
    %c0_6 = arith.constant 0 : index
    %7 = vector.load %arg4[%c0_5, %c0_6] : memref<128x128xbf16, #tpu.memory_space<vmem>>, vector<128x128xbf16>
    tpu.vector_store %arg4[%c0_5, %c0_6], %6 {strides = array<i32>} : memref<128x128xbf16, #tpu.memory_space<vmem>>, vector<128x128xbf16>,
    return
  }
  func.func @transform_0(%arg0: i32) -> (i32, i32) {
    %c0_i32 = arith.constant 0 : i32
    %c0_i32_0 = arith.constant 0 : i32
    return %arg0, %c0_i32 : i32, i32
  }
  func.func @transform_1(%arg0: i32) -> (i32, i32) {
    %c0_i32 = arith.constant 0 : i32
    %c0_i32_0 = arith.constant 0 : i32
    return %arg0, %c0_i32 : i32, i32
  }
  func.func @transform_2(%arg0: i32) -> (i32, i32) {
    %c0_i32 = arith.constant 0 : i32
    %c0_i32_0 = arith.constant 0 : i32
    %c0_i32_1 = arith.constant 0 : i32
    return %c0_i32, %c0_i32_0 : i32, i32
  }
  func.func @transform_3(%arg0: i32) -> (i32, i32) {
    %c0_i32 = arith.constant 0 : i32
    %c0_i32_0 = arith.constant 0 : i32
    return %arg0, %c0_i32 : i32, i32
  }
}

</mosaic_0001>

<bundles_post_ra>
// kernel: tpu_custom_call.1
= control target key start
LH: loop header
LB: loop body
LE: loop exit
PB: predicated region body
PF: predicated region fallthrough
CT: control target
= control target key end

     0   :  { %v407_v1 = vmov 0   ;;  %vm32_vm0 = vcmask 64512   ;;  %s549_s0 = inlined_call_operand.vmem [shape: f32[128,1], index: 0, kind: input, shape index: {}]   ;;  %s550_s1 = inlined_call_operand.vmem [shape: f32[128,8], index: 1, kind: input, shape index: {}]   ;;  %s551_s2 = inlined_call_operand.vmem [shape: f32[8,128], index: 2, kind: input, shape index: {}]   ;;  %s552_s3 = inlined_call_operand.hbm [shape: bf16[128,128], index: 3, kind: output, shape index: {}]  }
   0x1   :  { %v31_v0 = vld [vmem:[%s551_s2] sm:$0xff]  ;;  %379 = vset.pattern.permute.xlu1 %v407_v1  ;;  %378 = vset.pattern.permute.xlu0 %v407_v1  ;;  %v148_v2 = vld [vmem:[%s549_s0 + $0x10] sm:$0xff]  ;;  %v149_v9 = vld [vmem:[%s549_s0 + $0x18] sm:$0xff] }
   0x2   :  { %96 = vmatpush.msra.mxu0 %v31_v0  ;;  %371 = vmatpush.msra.mxu1 %v31_v0  ;;  %v146_v3 = vld [vmem:[%s549_s0] sm:$0xff]  ;;  %v147_v10 = vld [vmem:[%s549_s0 + $0x8] sm:$0xff] }
   0x3   :  { %v15_v4 = vld [vmem:[%s550_s1] sm:$0xff]  ;;  %372 = vmatpush.msra.mxu2 %v31_v0  ;;  %373 = vmatpush.msra.mxu3 %v31_v0  ;;  %v16_v11 = vld [vmem:[%s550_s1 + $0x8] sm:$0xff] }
   0x4   :  { %v19_v5 = vld [vmem:[%s550_s1 + $0x20] sm:$0xff]  ;;  %380 = vset.pattern.permute.xlu2 %v407_v1  ;;  %174 = vperm.xlu1 %379, %v148_v2   ;;  %v20_v12 = vld [vmem:[%s550_s1 + $0x28] sm:$0xff] }
   0x5   :  { %v23_v6 = vld [vmem:[%s550_s1 + $0x40] sm:$0xff]  ;;  %164 = vperm.xlu0 %378, %v146_v3   ;;  %308 = vmatmul.msk.f32.vlgmr.msra.gmra.mxu0 %vm32_vm0, %v15_v4  ;;  %v24_v13 = vld [vmem:[%s550_s1 + $0x48] sm:$0xff] }
   0x6   :  { %v27_v7 = vld [vmem:[%s550_s1 + $0x60] sm:$0xff]  ;;  %312 = vmatmul.msk.f32.vlgmr.msra.gmra.mxu1 %vm32_vm0, %v19_v5  ;;  %316 = vmatmul.msk.f32.vlgmr.msra.gmra.mxu2 %vm32_vm0, %v23_v6 }
   0x7   :  { %v150_v8 = vld [vmem:[%s549_s0 + $0x20] sm:$0xff]  ;;  %320 = vmatmul.msk.f32.vlgmr.msra.gmra.mxu3 %vm32_vm0, %v27_v7 }
   0x8   :  { %184 = vperm.xlu2 %380, %v150_v8  }
   0x9   :  { %8 = vsyncpa [#allocation3], 0  ;;  %v28_v14 = vld [vmem:[%s550_s1 + $0x68] sm:$0xff]  ;;  %v153_v16 = vld [vmem:[%s549_s0 + $0x38] sm:$0xff]  ;;  %s296_s23 = sshll.u32 %s552_s3, 4  ;;  %s409_s24 = smov 64   ;;  %s297_s23 = int_to_ptr.hbm [resolvable:$true] %s296_s23 }
   0xa   :  { %v151_v15 = vld [vmem:[%s549_s0 + $0x28] sm:$0xff]  ;;  %v152_v17 = vld [vmem:[%s549_s0 + $0x30] sm:$0xff]  ;;  %v154_v22 = vld [vmem:[%s549_s0 + $0x40] sm:$0xff]  ;;  %s410_s25 = smov 4  }
   0xb   :  { %v17_v18 = vld [vmem:[%s550_s1 + $0x10] sm:$0xff]  ;;  %v155_v24 = vld [vmem:[%s549_s0 + $0x48] sm:$0xff]  ;;  %v18_v25 = vld [vmem:[%s550_s1 + $0x18] sm:$0xff] }
   0xc   :  { %179 = vperm.xlu1 %379, %v149_v9   ;;  %v21_v19 = vld [vmem:[%s550_s1 + $0x30] sm:$0xff]  ;;  %v22_v26 = vld [vmem:[%s550_s1 + $0x38] sm:$0xff]  ;;  %v159_v30 = vld [vmem:[%s549_s0 + $0x68] sm:$0xff] }
   0xd   :  { %169 = vperm.xlu0 %378, %v147_v10   ;;  %309 = vmatmul.msk.f32.gmra.mxu0 %vm32_vm0, %v16_v11  ;;  %v25_v20 = vld [vmem:[%s550_s1 + $0x50] sm:$0xff]  ;;  %v26_v27 = vld [vmem:[%s550_s1 + $0x58] sm:$0xff]  ;;  %v158_v31 = vld [vmem:[%s549_s0 + $0x60] sm:$0xff] }
   0xe   :  { %313 = vmatmul.msk.f32.gmra.mxu1 %vm32_vm0, %v20_v12  ;;  %317 = vmatmul.msk.f32.gmra.mxu2 %vm32_vm0, %v24_v13  ;;  %v29_v21 = vld [vmem:[%s550_s1 + $0x70] sm:$0xff]  ;;  %v30_v28 = vld [vmem:[%s550_s1 + $0x78] sm:$0xff] }
   0xf   :  { %321 = vmatmul.msk.f32.gmra.mxu3 %vm32_vm0, %v28_v14  ;;  %v156_v23 = vld [vmem:[%s549_s0 + $0x50] sm:$0xff]  ;;  %v157_v29 = vld [vmem:[%s549_s0 + $0x58] sm:$0xff] }
  0x10   :  { %189 = vperm.xlu2 %380, %v151_v15   ;;  %v160_v32 = vld [vmem:[%s549_s0 + $0x70] sm:$0xff]  ;;  %v161_v33 = vld [vmem:[%s549_s0 + $0x78] sm:$0xff]  ;;  %s408_s0 = smov [#allocation2]  }
  0x11   :  { %s294_s20 = sshll.u32 %s408_s0, 4  ;;  %s295_s20 = int_to_ptr.vmem [resolvable:$true] %s294_s20 }
  0x14   :  { %199 = vperm.xlu1 %379, %v153_v16  }
  0x15   :  { %194 = vperm.xlu0 %378, %v152_v17   ;;  %310 = vmatmul.msk.f32.gmra.mxu0 %vm32_vm0, %v17_v18 }
  0x16   :  { %314 = vmatmul.msk.f32.gmra.mxu1 %vm32_vm0, %v21_v19  ;;  %318 = vmatmul.msk.f32.gmra.mxu2 %vm32_vm0, %v25_v20 }
  0x17   :  { %322 = vmatmul.msk.f32.gmra.mxu3 %vm32_vm0, %v29_v21 }
  0x18   :  { %204 = vperm.xlu2 %380, %v154_v22  }
  0x1c   :  { %214 = vperm.xlu1 %379, %v156_v23  }
  0x1d   :  { %209 = vperm.xlu0 %378, %v155_v24   ;;  %311 = vmatmul.msk.f32.gmra.mxu0 %vm32_vm0, %v18_v25 }
  0x1e   :  { %315 = vmatmul.msk.f32.gmra.mxu1 %vm32_vm0, %v22_v26  ;;  %319 = vmatmul.msk.f32.gmra.mxu2 %vm32_vm0, %v26_v27 }
  0x1f   :  { %323 = vmatmul.msk.f32.gmra.mxu3 %vm32_vm0, %v30_v28 }
  0x20   :  { %219 = vperm.xlu2 %380, %v157_v29  }
  0x24   :  { %229 = vperm.xlu1 %379, %v159_v30  }
  0x25   :  { %224 = vperm.xlu0 %378, %v158_v31  }
  0x28   :  { %234 = vperm.xlu2 %380, %v160_v32  }
  0x2d   :  { %239 = vperm.xlu0 %378, %v161_v33  }
  0x62   :  { %v185_v36 = vpop.permute.xlu2 %184 }
  0x6a   :  { %v190_v41 = vpop.permute.xlu2 %189 }
  0x72   :  { %v205_v53 = vpop.permute.xlu2 %204 }
  0x76   :  { %v175_v34 = vpop.permute.xlu1 %174 }
  0x77   :  { %v165_v35 = vpop.permute.xlu0 %164 }
  0x7a   :  { %v220_v3 = vpop.permute.xlu2 %219 }
  0x7e   :  { %v180_v37 = vpop.permute.xlu1 %179 }
  0x7f   :  { %v170_v38 = vpop.permute.xlu0 %169 }
  0x82   :  { %v98_v39 = vpop.f32.mrf.mxu0  ;;  %v235_v18 = vpop.permute.xlu2 %234 }
  0x83   :  { %v110_v40 = vpop.f32.mrf.mxu1  ;;  %v242_v47 = vmul.f32 %v165_v35, %v98_v39 }
  0x84   :  { %v246_v50 = vmul.f32 %v185_v36, %v110_v40 }
  0x86   :  { %v200_v42 = vpop.permute.xlu1 %199 }
  0x87   :  { %v195_v43 = vpop.permute.xlu0 %194 }
  0x89   :  { %v122_v44 = vpop.f32.mrf.mxu2 }
  0x8a   :  { %v134_v45 = vpop.f32.mrf.mxu3  ;;  %v101_v46 = vpop.f32.mrf.mxu0  ;;  %v250_v58 = vmul.f32 %v205_v53, %v122_v44 }
  0x8b   :  { %v243_v48 = vmul.f32 %v170_v38, %v101_v46  ;;  %v113_v49 = vpop.f32.mrf.mxu1 }
  0x8c   :  { %v247_v51 = vmul.f32 %v190_v41, %v113_v49 }
  0x8d   :  { %v327_v52 = vpack.c.bf16 %v243_v48, %v242_v47 }
  0x8e   :  { %v337_v54 = vpack.c.bf16 %v247_v51, %v246_v50  ;;  %v215_v55 = vpop.permute.xlu1 %214 }
  0x8f   :  { %328 = vst [vmem:[#allocation2] sm:$0xff] %v327_v52   ;;  %v210_v56 = vpop.permute.xlu0 %209 }
  0x90   :  { %365 = vst [vmem:[#allocation2 + $0x10] sm:$0xff] %v337_v54  }
  0x91   :  { %v125_v57 = vpop.f32.mrf.mxu2 }
  0x92   :  { %v251_v59 = vmul.f32 %v210_v56, %v125_v57  ;;  %v137_v60 = vpop.f32.mrf.mxu3  ;;  %v104_v61 = vpop.f32.mrf.mxu0 }
  0x93   :  { %v116_v62 = vpop.f32.mrf.mxu1  ;;  %v244_v9 = vmul.f32 %v175_v34, %v104_v61 }
  0x94   :  { %v347_v63 = vpack.c.bf16 %v251_v59, %v250_v58  ;;  %v248_v12 = vmul.f32 %v195_v43, %v116_v62 }
  0x96   :  { %367 = vst [vmem:[#allocation2 + $0x20] sm:$0xff] %v347_v63   ;;  %v230_v0 = vpop.permute.xlu1 %229 }
  0x97   :  { %v255_v1 = vmul.f32 %v230_v0, %v137_v60  ;;  %v225_v2 = vpop.permute.xlu0 %224 }
  0x98   :  { %v254_v4 = vmul.f32 %v225_v2, %v134_v45 }
  0x99   :  { %v128_v5 = vpop.f32.mrf.mxu2 }
  0x9a   :  { %v357_v6 = vpack.c.bf16 %v255_v1, %v254_v4  ;;  %v140_v7 = vpop.f32.mrf.mxu3  ;;  %v107_v8 = vpop.f32.mrf.mxu0  ;;  %v252_v19 = vmul.f32 %v215_v55, %v128_v5 }
  0x9b   :  { %v245_v10 = vmul.f32 %v180_v37, %v107_v8  ;;  %v119_v11 = vpop.f32.mrf.mxu1  ;;  %v256_v22 = vmul.f32 %v235_v18, %v140_v7 }
  0x9c   :  { %369 = vst [vmem:[#allocation2 + $0x30] sm:$0xff] %v357_v6   ;;  %v249_v13 = vmul.f32 %v200_v42, %v119_v11 }
  0x9d   :  { %v332_v14 = vpack.c.bf16 %v245_v10, %v244_v9 }
  0x9e   :  { %v342_v15 = vpack.c.bf16 %v249_v13, %v248_v12 }
  0x9f   :  { %364 = vst [vmem:[#allocation2 + $0x8] sm:$0xff] %v332_v14   ;;  %v240_v16 = vpop.permute.xlu0 %239 }
  0xa0   :  { %366 = vst [vmem:[#allocation2 + $0x18] sm:$0xff] %v342_v15  }
  0xa1   :  { %v131_v17 = vpop.f32.mrf.mxu2 }
  0xa2   :  { %v253_v20 = vmul.f32 %v220_v3, %v131_v17  ;;  %v143_v21 = vpop.f32.mrf.mxu3 }
  0xa3   :  { %v257_v23 = vmul.f32 %v240_v16, %v143_v21 }
  0xa4   :  { %v352_v24 = vpack.c.bf16 %v253_v20, %v252_v19 }
  0xa5   :  { %v362_v25 = vpack.c.bf16 %v257_v23, %v256_v22 }
  0xa6   :  { %368 = vst [vmem:[#allocation2 + $0x28] sm:$0xff] %v352_v24  }
  0xa7   :  { %370 = vst [vmem:[#allocation2 + $0x38] sm:$0xff] %v362_v25  }
  0xa8   :  { %302 = dma.vmem_to_hbm [thread:$0]  %s295_s20, 1024, %s297_s23, [#allocation3], %s409_s24, %s409_s24, %s410_s25  }
  0xa9   :  { %405 = dma.done.wait [#allocation3], 1024  }
  0xaa   :  { %406 = vsyncadd [#allocation3], 4294966272 }
  0xab   :  { %307 = vsyncpa [#allocation3], 1 }

</bundles_post_ra>
